<compile_context>
chip_gen: v7x
topology: tpu7x:2x2x1
jax: 0.10.0
libtpu: 0.0.40
codegen_flags: <defaults>
</compile_context>

<pallas_src>
import functools

import numpy as np
import jax
import jax.numpy as jnp
from jax.experimental import pallas as pl
from jax.experimental.pallas import tpu as pltpu

_LANES = 128        # vreg lane width (fast axis)
_SUBLANES = 8       # vreg sublane count (slow axis, f32)
_MAX_BLOCK_BYTES = 8 * 1024 * 1024  # per-block cap; double-buffered blocks stay far below VMEM limits


def _identity_copy_kernel(x_ref, o_ref):
    # One whole-tile load, one whole-tile (lane-dense, unmasked) store.
    o_ref[...] = x_ref[...]


@jax.jit
def _identity_impl(x):
    orig_shape = x.shape
    n = int(np.prod(orig_shape)) if orig_shape else 1

    if n != 0 and n % (_SUBLANES * _LANES) == 0:
        # Lane-dense path: view the tensor as a (rows, 128) slab.
        rows = n // _LANES
        row_tiles = rows // _SUBLANES
        x2 = x.reshape(rows, _LANES)

        bytes_per_row = _LANES * jnp.dtype(x.dtype).itemsize

        # >=2 grid steps (marked "parallel") when possible so v7x megacore can
        # split the copy across both TensorCores; otherwise a single block.
        num_blocks = 2 if (row_tiles >= 2 and row_tiles % 2 == 0) else 1
        # Grow the grid only if a block would blow the VMEM budget.
        while ((rows // num_blocks) * bytes_per_row > _MAX_BLOCK_BYTES
               and rows % (num_blocks * 2) == 0
               and (rows // (num_blocks * 2)) % _SUBLANES == 0):
            num_blocks *= 2
        block_rows = rows // num_blocks

        out2 = pl.pallas_call(
            _identity_copy_kernel,
            out_shape=jax.ShapeDtypeStruct((rows, _LANES), x.dtype),
            grid=(num_blocks,),
            in_specs=[pl.BlockSpec((block_rows, _LANES), lambda i: (i, 0))],
            out_specs=pl.BlockSpec((block_rows, _LANES), lambda i: (i, 0)),
            compiler_params=pltpu.CompilerParams(
                dimension_semantics=("parallel",)),
        )(x2)
        return out2.reshape(orig_shape)

    # Fallback for sizes that don't tile to (8, 128): one full-array 2-D block
    # (block_shape == full dims is always legal).
    x2 = x.reshape(1, max(n, 1))
    out2 = pl.pallas_call(
        _identity_copy_kernel,
        out_shape=jax.ShapeDtypeStruct(x2.shape, x.dtype),
        grid=(1,),
        in_specs=[pl.BlockSpec(x2.shape, lambda i: (0, 0))],
        out_specs=pl.BlockSpec(x2.shape, lambda i: (0, 0)),
    )(x2)
    return out2.reshape(orig_shape)


def identity(in_tensor, *ignore_args, **ignore_kwargs):
    """Pallas equivalent of the PyTorch Identity module's forward."""
    return _identity_impl(jnp.asarray(in_tensor))


if __name__ == "__main__":
    # Small deterministic input consistent with the module's typical use:
    # batch=2, channels=4, spatial 16x16.
    B, C, H, W = 2, 4, 16, 16
    key = jax.random.PRNGKey(0)
    x = jax.random.normal(key, (B, C, H, W), dtype=jnp.float32)

    out = identity(x, "ignored_positional", ignored_kwarg=123)
    out = jax.block_until_ready(out)

    # Identity must be bit-exact.
    assert out.shape == x.shape and out.dtype == x.dtype
    np.testing.assert_array_equal(np.asarray(out), np.asarray(x))

    print("KERNEL_OK")
</pallas_src>

<mosaic_0001>
module attributes {stable_mosaic.version = 11 : i64} {
  func.func @_identity_copy_kernel(%arg0: i32, %arg1: memref<8x128xf32, #tpu.memory_space<vmem>>, %arg2: memref<8x128xf32, #tpu.memory_space<vmem>>) attributes {dimension_semantics = [#tpu.dimension_semantics<parallel>], iteration_bounds = array<i64: 2>, scalar_prefetch = 0 : i64, scratch_operands = 0 : i64, tpu.core_type = #tpu.core_type<tc>, window_params = [{transform_indices = @transform_0, window_bounds = array<i64: 8, 128>}, {transform_indices = @transform_1, window_bounds = array<i64: 8, 128>}]} {
    %c0 = arith.constant 0 : index
    %c0_0 = arith.constant 0 : index
    %0 = vector.load %arg1[%c0, %c0_0] : memref<8x128xf32, #tpu.memory_space<vmem>>, vector<8x128xf32>
    %c0_1 = arith.constant 0 : index
    %c0_2 = arith.constant 0 : index
    %1 = vector.load %arg2[%c0_1, %c0_2] : memref<8x128xf32, #tpu.memory_space<vmem>>, vector<8x128xf32>
    tpu.vector_store %arg2[%c0_1, %c0_2], %0 {strides = array<i32>} : memref<8x128xf32, #tpu.memory_space<vmem>>, vector<8x128xf32>,
    return
  }
  func.func @transform_0(%arg0: i32) -> (i32, i32) {
    %c0_i32 = arith.constant 0 : i32
    %c0_i32_0 = arith.constant 0 : i32
    return %arg0, %c0_i32 : i32, i32
  }
  func.func @transform_1(%arg0: i32) -> (i32, i32) {
    %c0_i32 = arith.constant 0 : i32
    %c0_i32_0 = arith.constant 0 : i32
    return %arg0, %c0_i32 : i32, i32
  }
}

</mosaic_0001>

<bundles_post_ra>
// kernel: _identity_impl.1
= control target key start
LH: loop header
LB: loop body
LE: loop exit
PB: predicated region body
PF: predicated region fallthrough
CT: control target
= control target key end

     0   :  { %s188_s6 = smov 0   ;;  %s208_s0 = inlined_call_operand.vmem [shape: f32[16,128], index: 0, kind: input, shape index: {}]   ;;  %s209_s1 = inlined_call_operand.vmem [shape: f32[16,128], index: 1, kind: output, shape index: {}]  }
   0x1 LB: > { %s167_s7 = sadd.s32 4294967295, %s190_s6   ;;  %p171_p0 = scmp.ge.s32.totalorder %s190_s6, 1  ;;  %s190_s6 = sphi %s188_s6, %s11_s6  }
   0x2   : > { %p86_p1 = scmp.lt.s32.totalorder %s190_s6, 3 }
   0x4   : > { %p87_p2 = pnand %p171_p0, %p86_p1 }
   0x5   : > { %p104_p3 = scmp.lt.s32.totalorder (!%p87_p2), %s167_s7, 1 }
   0x6   : > { %90 = sbr.rel (%p87_p2) target bundleno = 18 (0x12), region = 24 }
   0xd   : > { %s211_s7 = smov (!%p104_p3, %s167_s7), 1 }
   0xe   : > { %s172_s8 = sshll.u32 %s211_s7, 3 }
   0xf   : > { %s107_s11 = scalar_lea.vmem %s208_s0, %s172_s8  ;;  %s111_s14 = scalar_lea.vmem %s209_s1, %s172_s8 }
  0x10   : > { %v112_v0 = vld [vmem:[%s107_s11] sm:$0xff] }
  0x11   : > { %113 = vst [vmem:[%s111_s14] sm:$0xff] %v112_v0 }
  0x12 PF: > { %s11_s6 = sadd.s32 1, %s190_s6  }
  0x13   : > { %p8_p4 = scmp.ge.s32.totalorder %s11_s6, 4  }
  0x15   :  { %10 = sbr.rel (!%p8_p4) target bundleno = 1 (0x1), region = 54 }

</bundles_post_ra>
